<compile_context>
chip_gen: v5e
topology: v5e:2x2
jax: 0.10.0
libtpu: 0.0.40
codegen_flags: <defaults>
</compile_context>

<pallas_src>
import functools

import jax
import jax.numpy as jnp
from jax.experimental import pallas as pl
from jax.experimental.pallas import tpu as pltpu


def _linear(x, w_ref, b_ref, act):
    # bf16 x bf16 on the MXU, f32 accumulation, f32 bias.
    y = jnp.dot(x.astype(jnp.bfloat16), w_ref[...],
                preferred_element_type=jnp.float32) + b_ref[...]
    if act == "relu":
        y = jnp.maximum(y, 0.0)
    elif act == "tanh":
        y = jnp.tanh(y)
    return y


def autoencoder_kernel(x_ref,
                       w0, b0, w1, b1, w2, b2,      # encoder D->64->32->12
                       w34, b34,                    # fused bottleneck 12->(3)->12
                       w5, b5, w6, b6, w7, b7,      # decoder 12->32->64->D
                       out_ref):
    x = x_ref[...]                                  # (TB, D) bf16
    h = _linear(x, w0, b0, "relu")                  # (TB, 64)
    h = _linear(h, w1, b1, "relu")                  # (TB, 32)
    h = _linear(h, w2, b2, "relu")                  # (TB, 12)
    h = _linear(h, w34, b34, "relu")                # (TB, 12) == relu(W4(W3 h + b3) + b4)
    h = _linear(h, w5, b5, "relu")                  # (TB, 32)
    h = _linear(h, w6, b6, "relu")                  # (TB, 64)
    out_ref[...] = _linear(h, w7, b7, "tanh").astype(out_ref.dtype)   # (TB, D) bf16


def init_params(key, window_size, num_components, num_levels):
    """Deterministic init matching torch.nn.Linear default: U(-1/sqrt(in), 1/sqrt(in))."""
    D = window_size * (num_components + num_levels + 1)
    dims = [(D, 64), (64, 32), (32, 12), (12, 3),      # encoder
            (3, 12), (12, 32), (32, 64), (64, D)]      # decoder
    params = []
    for (fan_in, fan_out) in dims:
        key, kw, kb = jax.random.split(key, 3)
        bound = 1.0 / jnp.sqrt(jnp.float32(fan_in))
        w = jax.random.uniform(kw, (fan_in, fan_out), jnp.float32, -bound, bound)
        b = jax.random.uniform(kb, (fan_out,), jnp.float32, -bound, bound)
        params.append((w, b))
    return params


def prepare_params(params):
    """Fuse the activation-free 12->3->12 pair and cast weights to bf16
    (biases stay f32). No feature-dim padding: D=64 blocks are legal as-is."""
    (w0, b0), (w1, b1), (w2, b2), (w3, b3), (w4, b4), (w5, b5), (w6, b6), (w7, b7) = params

    # Exact fusion: there is no activation between Linear(12->3) and Linear(3->12).
    w34 = w3 @ w4                    # (12, 12)
    b34 = b3 @ w4 + b4               # (12,)

    ws = [w0, w1, w2, w34, w5, w6, w7]
    bs = [b0, b1, b2, b34, b5, b6, b7]
    flat = []
    for w, b in zip(ws, bs):
        flat.append(w.astype(jnp.bfloat16))
        flat.append(b.astype(jnp.float32).reshape(1, -1))
    return tuple(flat)


def choose_tb(batch):
    """Pick a batch tile: >=4 grid steps when the batch allows it (so each
    v7x TensorCore gets >=2 pipelined steps), rows a multiple of 128 and
    capped at 512 to amortize per-step overhead on v5e/v6e."""
    if batch <= 128:
        return 128
    tb = min(512, pl.cdiv(batch, 4))
    tb = max(128, (tb // 128) * 128)
    return tb


@functools.partial(jax.jit, static_argnames=("tb",))
def autoencoder_forward(embedding_matrix, flat_params, tb):
    """Mirrors AutoEncoder.forward: returns (embedding, decoder(encoder(embedding)))."""
    B = embedding_matrix.shape[0]
    embedding = embedding_matrix.reshape(B, -1).astype(jnp.float32)   # (B, D) f32
    D = embedding.shape[1]
    B_pad = pl.cdiv(B, tb) * tb

    # Single fused reshape+cast(+pad) pass over the input; no feature padding.
    x = embedding.astype(jnp.bfloat16)
    if B_pad != B:
        x = jnp.pad(x, ((0, B_pad - B), (0, 0)))

    operands = [x] + list(flat_params)

    in_specs = [pl.BlockSpec((tb, D), lambda i: (i, 0))]              # batch-tiled activations
    in_specs += [pl.BlockSpec(p.shape, lambda i: (0, 0))              # weights stay VMEM-resident
                 for p in flat_params]
    out_spec = pl.BlockSpec((tb, D), lambda i: (i, 0))

    # Advisory cost estimate so XLA can schedule around the kernel.
    w_dims = [(flat_params[2 * k].shape[0], flat_params[2 * k].shape[1]) for k in range(7)]
    flops = 2 * B_pad * sum(fi * fo for fi, fo in w_dims)
    transcendentals = B_pad * D                                        # tanh
    bytes_accessed = (2 * B_pad * D * 2                                # bf16 in + bf16 out
                      + sum(p.size * p.dtype.itemsize for p in flat_params))

    recon_pad = pl.pallas_call(
        autoencoder_kernel,
        out_shape=jax.ShapeDtypeStruct((B_pad, D), jnp.bfloat16),
        grid=(B_pad // tb,),
        in_specs=in_specs,
        out_specs=out_spec,
        compiler_params=pltpu.CompilerParams(
            dimension_semantics=("parallel",)),        # megacore on v7x, neutral elsewhere
        cost_estimate=pl.CostEstimate(flops=flops,
                                      transcendentals=transcendentals,
                                      bytes_accessed=bytes_accessed),
    )(*operands)

    # Only the batch padding (if any) is sliced away; padded rows contain
    # tanh of the bias chain and must never be consumed directly.
    recon = recon_pad if B_pad == B else recon_pad[:B]
    return embedding, recon


def reference_forward(embedding_matrix, params):
    """Pure-JAX f32 reference of the original (unfused) module."""
    B = embedding_matrix.shape[0]
    x = embedding_matrix.reshape(B, -1).astype(jnp.float32)
    acts = ["relu", "relu", "relu", None, "relu", "relu", "relu", "tanh"]
    for (w, b), a in zip(params, acts):
        x = x @ w + b
        if a == "relu":
            x = jnp.maximum(x, 0.0)
        elif a == "tanh":
            x = jnp.tanh(x)
    return x


if __name__ == "__main__":
    num_components = 4
    num_levels = 3
    window_size = 8
    feat = num_components + num_levels + 1          # 8
    D = window_size * feat                          # 64
    batch = 500                                     # exercises batch padding + multi-step grid

    key = jax.random.PRNGKey(0)
    key, k_emb = jax.random.split(key)

    # Simulated AutoEncoderEmbedding output: (batch, window_size, C + L + 1)
    embedding_matrix = jax.random.normal(
        k_emb, (batch, window_size, feat), jnp.float32)

    params = init_params(key, window_size, num_components, num_levels)
    flat_params = prepare_params(params)

    tb = choose_tb(batch)                           # 128 -> grid of 4 steps
    embedding, recon = autoencoder_forward(embedding_matrix, flat_params, tb)
    jax.block_until_ready((embedding, recon))

    assert embedding.shape == (batch, D)
    assert recon.shape == (batch, D)
    recon_f32 = recon.astype(jnp.float32)
    assert bool(jnp.all(jnp.isfinite(recon_f32)))
    assert bool(jnp.all(jnp.abs(recon_f32) <= 1.0))  # Tanh output range

    # Correctness vs. pure-JAX f32 reference (bf16 weights/activations -> loose tolerance).
    ref = reference_forward(embedding_matrix, params)
    max_err = float(jnp.max(jnp.abs(recon_f32 - ref)))
    assert max_err < 0.1, f"max abs err {max_err}"

    print("KERNEL_OK")
</pallas_src>

<mosaic_0001>
module attributes {stable_mosaic.version = 11 : i64} {
  func.func @autoencoder_kernel(%arg0: i32, %arg1: memref<128x64xbf16, #tpu.memory_space<vmem>>, %arg2: memref<64x64xbf16, #tpu.memory_space<vmem>>, %arg3: memref<1x64xf32, #tpu.memory_space<vmem>>, %arg4: memref<64x32xbf16, #tpu.memory_space<vmem>>, %arg5: memref<1x32xf32, #tpu.memory_space<vmem>>, %arg6: memref<32x12xbf16, #tpu.memory_space<vmem>>, %arg7: memref<1x12xf32, #tpu.memory_space<vmem>>, %arg8: memref<12x12xbf16, #tpu.memory_space<vmem>>, %arg9: memref<1x12xf32, #tpu.memory_space<vmem>>, %arg10: memref<12x32xbf16, #tpu.memory_space<vmem>>, %arg11: memref<1x32xf32, #tpu.memory_space<vmem>>, %arg12: memref<32x64xbf16, #tpu.memory_space<vmem>>, %arg13: memref<1x64xf32, #tpu.memory_space<vmem>>, %arg14: memref<64x64xbf16, #tpu.memory_space<vmem>>, %arg15: memref<1x64xf32, #tpu.memory_space<vmem>>, %arg16: memref<128x64xbf16, #tpu.memory_space<vmem>>) attributes {dimension_semantics = [#tpu.dimension_semantics<parallel>], iteration_bounds = array<i64: 4>, scalar_prefetch = 0 : i64, scratch_operands = 0 : i64, tpu.core_type = #tpu.core_type<tc>, window_params = [{transform_indices = @transform_0, window_bounds = array<i64: 128, 64>}, {pipeline_mode = #tpu.pipeline_mode<synchronous>, transform_indices = @transform_1, window_bounds = array<i64: 64, 64>}, {pipeline_mode = #tpu.pipeline_mode<synchronous>, transform_indices = @transform_2, window_bounds = array<i64: 1, 64>}, {pipeline_mode = #tpu.pipeline_mode<synchronous>, transform_indices = @transform_3, window_bounds = array<i64: 64, 32>}, {pipeline_mode = #tpu.pipeline_mode<synchronous>, transform_indices = @transform_4, window_bounds = array<i64: 1, 32>}, {pipeline_mode = #tpu.pipeline_mode<synchronous>, transform_indices = @transform_5, window_bounds = array<i64: 32, 12>}, {pipeline_mode = #tpu.pipeline_mode<synchronous>, transform_indices = @transform_6, window_bounds = array<i64: 1, 12>}, {pipeline_mode = #tpu.pipeline_mode<synchronous>, transform_indices = @transform_7, window_bounds = array<i64: 12, 12>}, {pipeline_mode = #tpu.pipeline_mode<synchronous>, transform_indices = @transform_8, window_bounds = array<i64: 1, 12>}, {pipeline_mode = #tpu.pipeline_mode<synchronous>, transform_indices = @transform_9, window_bounds = array<i64: 12, 32>}, {pipeline_mode = #tpu.pipeline_mode<synchronous>, transform_indices = @transform_10, window_bounds = array<i64: 1, 32>}, {pipeline_mode = #tpu.pipeline_mode<synchronous>, transform_indices = @transform_11, window_bounds = array<i64: 32, 64>}, {pipeline_mode = #tpu.pipeline_mode<synchronous>, transform_indices = @transform_12, window_bounds = array<i64: 1, 64>}, {pipeline_mode = #tpu.pipeline_mode<synchronous>, transform_indices = @transform_13, window_bounds = array<i64: 64, 64>}, {pipeline_mode = #tpu.pipeline_mode<synchronous>, transform_indices = @transform_14, window_bounds = array<i64: 1, 64>}, {transform_indices = @transform_15, window_bounds = array<i64: 128, 64>}]} {
    %c0 = arith.constant 0 : index
    %c0_0 = arith.constant 0 : index
    %0 = vector.load %arg1[%c0, %c0_0] : memref<128x64xbf16, #tpu.memory_space<vmem>>, vector<128x64xbf16>
    %c0_1 = arith.constant 0 : index
    %c0_2 = arith.constant 0 : index
    %1 = vector.load %arg2[%c0_1, %c0_2] : memref<64x64xbf16, #tpu.memory_space<vmem>>, vector<64x64xbf16>
    %cst = arith.constant dense<0.000000e+00> : vector<128x64xf32>
    %2 = tpu.matmul %0, %1, %cst {dimension_numbers = #tpu.dot_dimension_numbers<[1], [0], [0], [1], [0, 0, 1, 1], [], []>} : vector<128x64xbf16>, vector<64x64xbf16>, vector<128x64xf32> -> vector<128x64xf32>
    %c0_3 = arith.constant 0 : index
    %c0_4 = arith.constant 0 : index
    %3 = vector.load %arg3[%c0_3, %c0_4] : memref<1x64xf32, #tpu.memory_space<vmem>>, vector<1x64xf32>
    %4 = vector.broadcast %3 : vector<1x64xf32> to vector<128x64xf32>
    %5 = arith.addf %2, %4 : vector<128x64xf32>
    %cst_5 = arith.constant 0.000000e+00 : f32
    %6 = vector.broadcast %cst_5 : f32 to vector<128x64xf32>
    %7 = arith.maximumf %5, %6 : vector<128x64xf32>
    %8 = arith.truncf %7 : vector<128x64xf32> to vector<128x64xbf16>
    %c0_6 = arith.constant 0 : index
    %c0_7 = arith.constant 0 : index
    %9 = vector.load %arg4[%c0_6, %c0_7] : memref<64x32xbf16, #tpu.memory_space<vmem>>, vector<64x32xbf16>
    %cst_8 = arith.constant dense<0.000000e+00> : vector<128x32xf32>
    %10 = tpu.matmul %8, %9, %cst_8 {dimension_numbers = #tpu.dot_dimension_numbers<[1], [0], [0], [1], [0, 0, 1, 1], [], []>} : vector<128x64xbf16>, vector<64x32xbf16>, vector<128x32xf32> -> vector<128x32xf32>
    %c0_9 = arith.constant 0 : index
    %c0_10 = arith.constant 0 : index
    %11 = vector.load %arg5[%c0_9, %c0_10] : memref<1x32xf32, #tpu.memory_space<vmem>>, vector<1x32xf32>
    %12 = vector.broadcast %11 : vector<1x32xf32> to vector<128x32xf32>
    %13 = arith.addf %10, %12 : vector<128x32xf32>
    %cst_11 = arith.constant 0.000000e+00 : f32
    %14 = vector.broadcast %cst_11 : f32 to vector<128x32xf32>
    %15 = arith.maximumf %13, %14 : vector<128x32xf32>
    %16 = arith.truncf %15 : vector<128x32xf32> to vector<128x32xbf16>
    %c0_12 = arith.constant 0 : index
    %c0_13 = arith.constant 0 : index
    %17 = vector.load %arg6[%c0_12, %c0_13] : memref<32x12xbf16, #tpu.memory_space<vmem>>, vector<32x12xbf16>
    %cst_14 = arith.constant dense<0.000000e+00> : vector<128x12xf32>
    %18 = tpu.matmul %16, %17, %cst_14 {dimension_numbers = #tpu.dot_dimension_numbers<[1], [0], [0], [1], [0, 0, 1, 1], [], []>} : vector<128x32xbf16>, vector<32x12xbf16>, vector<128x12xf32> -> vector<128x12xf32>
    %c0_15 = arith.constant 0 : index
    %c0_16 = arith.constant 0 : index
    %19 = vector.load %arg7[%c0_15, %c0_16] : memref<1x12xf32, #tpu.memory_space<vmem>>, vector<1x12xf32>
    %20 = vector.broadcast %19 : vector<1x12xf32> to vector<128x12xf32>
    %21 = arith.addf %18, %20 : vector<128x12xf32>
    %cst_17 = arith.constant 0.000000e+00 : f32
    %22 = vector.broadcast %cst_17 : f32 to vector<128x12xf32>
    %23 = arith.maximumf %21, %22 : vector<128x12xf32>
    %24 = arith.truncf %23 : vector<128x12xf32> to vector<128x12xbf16>
    %c0_18 = arith.constant 0 : index
    %c0_19 = arith.constant 0 : index
    %25 = vector.load %arg8[%c0_18, %c0_19] : memref<12x12xbf16, #tpu.memory_space<vmem>>, vector<12x12xbf16>
    %cst_20 = arith.constant dense<0.000000e+00> : vector<128x12xf32>
    %26 = tpu.matmul %24, %25, %cst_20 {dimension_numbers = #tpu.dot_dimension_numbers<[1], [0], [0], [1], [0, 0, 1, 1], [], []>} : vector<128x12xbf16>, vector<12x12xbf16>, vector<128x12xf32> -> vector<128x12xf32>
    %c0_21 = arith.constant 0 : index
    %c0_22 = arith.constant 0 : index
    %27 = vector.load %arg9[%c0_21, %c0_22] : memref<1x12xf32, #tpu.memory_space<vmem>>, vector<1x12xf32>
    %28 = vector.broadcast %27 : vector<1x12xf32> to vector<128x12xf32>
    %29 = arith.addf %26, %28 : vector<128x12xf32>
    %cst_23 = arith.constant 0.000000e+00 : f32
    %30 = vector.broadcast %cst_23 : f32 to vector<128x12xf32>
    %31 = arith.maximumf %29, %30 : vector<128x12xf32>
    %32 = arith.truncf %31 : vector<128x12xf32> to vector<128x12xbf16>
    %c0_24 = arith.constant 0 : index
    %c0_25 = arith.constant 0 : index
    %33 = vector.load %arg10[%c0_24, %c0_25] : memref<12x32xbf16, #tpu.memory_space<vmem>>, vector<12x32xbf16>
    %cst_26 = arith.constant dense<0.000000e+00> : vector<128x32xf32>
    %34 = tpu.matmul %32, %33, %cst_26 {dimension_numbers = #tpu.dot_dimension_numbers<[1], [0], [0], [1], [0, 0, 1, 1], [], []>} : vector<128x12xbf16>, vector<12x32xbf16>, vector<128x32xf32> -> vector<128x32xf32>
    %c0_27 = arith.constant 0 : index
    %c0_28 = arith.constant 0 : index
    %35 = vector.load %arg11[%c0_27, %c0_28] : memref<1x32xf32, #tpu.memory_space<vmem>>, vector<1x32xf32>
    %36 = vector.broadcast %35 : vector<1x32xf32> to vector<128x32xf32>
    %37 = arith.addf %34, %36 : vector<128x32xf32>
    %cst_29 = arith.constant 0.000000e+00 : f32
    %38 = vector.broadcast %cst_29 : f32 to vector<128x32xf32>
    %39 = arith.maximumf %37, %38 : vector<128x32xf32>
    %40 = arith.truncf %39 : vector<128x32xf32> to vector<128x32xbf16>
    %c0_30 = arith.constant 0 : index
    %c0_31 = arith.constant 0 : index
    %41 = vector.load %arg12[%c0_30, %c0_31] : memref<32x64xbf16, #tpu.memory_space<vmem>>, vector<32x64xbf16>
    %cst_32 = arith.constant dense<0.000000e+00> : vector<128x64xf32>
    %42 = tpu.matmul %40, %41, %cst_32 {dimension_numbers = #tpu.dot_dimension_numbers<[1], [0], [0], [1], [0, 0, 1, 1], [], []>} : vector<128x32xbf16>, vector<32x64xbf16>, vector<128x64xf32> -> vector<128x64xf32>
    %c0_33 = arith.constant 0 : index
    %c0_34 = arith.constant 0 : index
    %43 = vector.load %arg13[%c0_33, %c0_34] : memref<1x64xf32, #tpu.memory_space<vmem>>, vector<1x64xf32>
    %44 = vector.broadcast %43 : vector<1x64xf32> to vector<128x64xf32>
    %45 = arith.addf %42, %44 : vector<128x64xf32>
    %cst_35 = arith.constant 0.000000e+00 : f32
    %46 = vector.broadcast %cst_35 : f32 to vector<128x64xf32>
    %47 = arith.maximumf %45, %46 : vector<128x64xf32>
    %48 = arith.truncf %47 : vector<128x64xf32> to vector<128x64xbf16>
    %c0_36 = arith.constant 0 : index
    %c0_37 = arith.constant 0 : index
    %49 = vector.load %arg14[%c0_36, %c0_37] : memref<64x64xbf16, #tpu.memory_space<vmem>>, vector<64x64xbf16>
    %cst_38 = arith.constant dense<0.000000e+00> : vector<128x64xf32>
    %50 = tpu.matmul %48, %49, %cst_38 {dimension_numbers = #tpu.dot_dimension_numbers<[1], [0], [0], [1], [0, 0, 1, 1], [], []>} : vector<128x64xbf16>, vector<64x64xbf16>, vector<128x64xf32> -> vector<128x64xf32>
    %c0_39 = arith.constant 0 : index
    %c0_40 = arith.constant 0 : index
    %51 = vector.load %arg15[%c0_39, %c0_40] : memref<1x64xf32, #tpu.memory_space<vmem>>, vector<1x64xf32>
    %52 = vector.broadcast %51 : vector<1x64xf32> to vector<128x64xf32>
    %53 = arith.addf %50, %52 : vector<128x64xf32>
    %54 = math.tanh %53 : vector<128x64xf32>
    %55 = arith.truncf %54 : vector<128x64xf32> to vector<128x64xbf16>
    %c0_41 = arith.constant 0 : index
    %c0_42 = arith.constant 0 : index
    %56 = vector.load %arg16[%c0_41, %c0_42] : memref<128x64xbf16, #tpu.memory_space<vmem>>, vector<128x64xbf16>
    tpu.vector_store %arg16[%c0_41, %c0_42], %55 {strides = array<i32>} : memref<128x64xbf16, #tpu.memory_space<vmem>>, vector<128x64xbf16>,
    return
  }
  func.func @transform_0(%arg0: i32) -> (i32, i32) {
    %c0_i32 = arith.constant 0 : i32
    %c0_i32_0 = arith.constant 0 : i32
    return %arg0, %c0_i32 : i32, i32
  }
  func.func @transform_1(%arg0: i32) -> (i32, i32) {
    %c0_i32 = arith.constant 0 : i32
    %c0_i32_0 = arith.constant 0 : i32
    %c0_i32_1 = arith.constant 0 : i32
    return %c0_i32, %c0_i32_0 : i32, i32
  }
  func.func @transform_2(%arg0: i32) -> (i32, i32) {
    %c0_i32 = arith.constant 0 : i32
    %c0_i32_0 = arith.constant 0 : i32
    %c0_i32_1 = arith.constant 0 : i32
    return %c0_i32, %c0_i32_0 : i32, i32
  }
  func.func @transform_3(%arg0: i32) -> (i32, i32) {
    %c0_i32 = arith.constant 0 : i32
    %c0_i32_0 = arith.constant 0 : i32
    %c0_i32_1 = arith.constant 0 : i32
    return %c0_i32, %c0_i32_0 : i32, i32
  }
  func.func @transform_4(%arg0: i32) -> (i32, i32) {
    %c0_i32 = arith.constant 0 : i32
    %c0_i32_0 = arith.constant 0 : i32
    %c0_i32_1 = arith.constant 0 : i32
    return %c0_i32, %c0_i32_0 : i32, i32
  }
  func.func @transform_5(%arg0: i32) -> (i32, i32) {
    %c0_i32 = arith.constant 0 : i32
    %c0_i32_0 = arith.constant 0 : i32
    %c0_i32_1 = arith.constant 0 : i32
    return %c0_i32, %c0_i32_0 : i32, i32
  }
  func.func @transform_6(%arg0: i32) -> (i32, i32) {
    %c0_i32 = arith.constant 0 : i32
    %c0_i32_0 = arith.constant 0 : i32
    %c0_i32_1 = arith.constant 0 : i32
    return %c0_i32, %c0_i32_0 : i32, i32
  }
  func.func @transform_7(%arg0: i32) -> (i32, i32) {
    %c0_i32 = arith.constant 0 : i32
    %c0_i32_0 = arith.constant 0 : i32
    %c0_i32_1 = arith.constant 0 : i32
    return %c0_i32, %c0_i32_0 : i32, i32
  }
  func.func @transform_8(%arg0: i32) -> (i32, i32) {
    %c0_i32 = arith.constant 0 : i32
    %c0_i32_0 = arith.constant 0 : i32
    %c0_i32_1 = arith.constant 0 : i32
    return %c0_i32, %c0_i32_0 : i32, i32
  }
  func.func @transform_9(%arg0: i32) -> (i32, i32) {
    %c0_i32 = arith.constant 0 : i32
    %c0_i32_0 = arith.constant 0 : i32
    %c0_i32_1 = arith.constant 0 : i32
    return %c0_i32, %c0_i32_0 : i32, i32
  }
  func.func @transform_10(%arg0: i32) -> (i32, i32) {
    %c0_i32 = arith.constant 0 : i32
    %c0_i32_0 = arith.constant 0 : i32
    %c0_i32_1 = arith.constant 0 : i32
    return %c0_i32, %c0_i32_0 : i32, i32
  }
  func.func @transform_11(%arg0: i32) -> (i32, i32) {
    %c0_i32 = arith.constant 0 : i32
    %c0_i32_0 = arith.constant 0 : i32
    %c0_i32_1 = arith.constant 0 : i32
    return %c0_i32, %c0_i32_0 : i32, i32
  }
  func.func @transform_12(%arg0: i32) -> (i32, i32) {
    %c0_i32 = arith.constant 0 : i32
    %c0_i32_0 = arith.constant 0 : i32
    %c0_i32_1 = arith.constant 0 : i32
    return %c0_i32, %c0_i32_0 : i32, i32
  }
  func.func @transform_13(%arg0: i32) -> (i32, i32) {
    %c0_i32 = arith.constant 0 : i32
    %c0_i32_0 = arith.constant 0 : i32
    %c0_i32_1 = arith.constant 0 : i32
    return %c0_i32, %c0_i32_0 : i32, i32
  }
  func.func @transform_14(%arg0: i32) -> (i32, i32) {
    %c0_i32 = arith.constant 0 : i32
    %c0_i32_0 = arith.constant 0 : i32
    %c0_i32_1 = arith.constant 0 : i32
    return %c0_i32, %c0_i32_0 : i32, i32
  }
  func.func @transform_15(%arg0: i32) -> (i32, i32) {
    %c0_i32 = arith.constant 0 : i32
    %c0_i32_0 = arith.constant 0 : i32
    return %arg0, %c0_i32 : i32, i32
  }
}

</mosaic_0001>

<bundles_post_ra>
// kernel: autoencoder_forward.1
= control target key start
LH: loop header
LB: loop body
LE: loop exit
PB: predicated region body
PF: predicated region fallthrough
CT: control target
= control target key end

     0   :  { %s1834_s18 = smov 0   ;;  %s2139_s0 = inlined_call_operand.vmem [shape: bf16[512,64], index: 0, kind: input, shape index: {}]   ;;  %s2140_s1 = inlined_call_operand.vmem [shape: bf16[64,64], index: 1, kind: input, shape index: {}]   ;;  %s2141_s2 = inlined_call_operand.vmem [shape: f32[1,64], index: 2, kind: input, shape index: {}]   ;;  %s2142_s3 = inlined_call_operand.vmem [shape: bf16[64,32], index: 3, kind: input, shape index: {}]   ;;  %s2143_s4 = inlined_call_operand.vmem [shape: f32[1,32], index: 4, kind: input, shape index: {}]   ;;  %s2144_s5 = inlined_call_operand.vmem [shape: bf16[32,12], index: 5, kind: input, shape index: {}]   ;;  %s2145_s6 = inlined_call_operand.vmem [shape: f32[1,12], index: 6, kind: input, shape index: {}]   ;;  %s2146_s7 = inlined_call_operand.vmem [shape: bf16[12,12], index: 7, kind: input, shape index: {}]   ;;  %s2147_s8 = inlined_call_operand.vmem [shape: f32[1,12], index: 8, kind: input, shape index: {}]   ;;  %s2148_s9 = inlined_call_operand.vmem [shape: bf16[12,32], index: 9, kind: input, shape index: {}]   ;;  %s2149_s10 = inlined_call_operand.vmem [shape: f32[1,32], index: 10, kind: input, shape index: {}]   ;;  %s2150_s11 = inlined_call_operand.vmem [shape: bf16[32,64], index: 11, kind: input, shape index: {}]   ;;  %s2151_s12 = inlined_call_operand.vmem [shape: f32[1,64], index: 12, kind: input, shape index: {}]   ;;  %s2152_s13 = inlined_call_operand.vmem [shape: bf16[64,64], index: 13, kind: input, shape index: {}]   ;;  %s2153_s14 = inlined_call_operand.vmem [shape: f32[1,64], index: 14, kind: input, shape index: {}]   ;;  %s2154_s15 = inlined_call_operand.vmem [shape: bf16[512,64], index: 15, kind: output, shape index: {}]  }
   0x1 LB: > { %s1495_s19 = sadd.s32 4294967295, %s1752_s18   ;;  %p1499_p0 = scmp.ge.s32.totalorder %s1752_s18, 1  ;;  %s1752_s18 = sphi %s1834_s18, %s25_s18  }
   0x2   : > { %p438_p1 = scmp.lt.s32.totalorder %s1752_s18, 5 }
   0x4   : > { %p439_p2 = pnand %p1499_p0, %p438_p1 }
   0x5   : > { %s1500_s22 = sshll.u32 (!%p439_p2), %s1495_s19, 4 }
   0x6   : > { %442 = sbr.rel (%p439_p2) target bundleno = 1149 (0x47d), region = 80  ;;  %p487_p3 = scmp.lt.s32.totalorder (!%p439_p2), %s1500_s22, 63 }
   0xb   : > { %v1677_v0 = vld [vmem:[%s2140_s1 + $0x18] sm:$0xff]  ;;  %v1676_v1 = vld [vmem:[%s2140_s1 + $0x10] sm:$0xff]  ;;  %s2156_s22 = smov (!%p487_p3, %s1500_s22), 63  ;;  %v1675_v2 = vld [vmem:[%s2140_s1 + $0x8] sm:$0xff]  ;;  %vm591_vm0 = vcmask 523264   ;;  %vm842_vm1 = vcmask 261120  }
   0xc   : > { %620 = vmatpush.bf16.msra.mxu0 %v1677_v0  ;;  %1692 = vmatpush.bf16.msra.mxu1 %v1677_v0  ;;  %s1501_s27 = sshll.u32 %s2156_s22, 2  ;;  %v1674_v3 = vld [vmem:[%s2140_s1] sm:$0xff]  ;;  %v1681_v9 = vld [vmem:[%s2142_s3 + $0x18] sm:$0xff]  ;;  %v1680_v10 = vld [vmem:[%s2142_s3 + $0x10] sm:$0xff]  ;;  %vm976_vm2 = vcmask 1045504   ;;  %vm951_vm3 = vcmask 97280  }
   0xd   : > { %s490_s17 = scalar_lea.vmem %s2139_s0, %s1501_s27  ;;  %v1679_v11 = vld [vmem:[%s2142_s3 + $0x8] sm:$0xff]  ;;  %v1678_v15 = vld [vmem:[%s2142_s3] sm:$0xff]  ;;  %vm1422_vm4 = vcmask 519168  }
   0xe   : > { %v1666_v4 = vld [vmem:[%s490_s17] sm:$0xff]  ;;  %v1667_v5 = vld [vmem:[%s490_s17 + $0x8] sm:$0xff]  ;;  %v1668_v6 = vld [vmem:[%s490_s17 + $0x10] sm:$0xff] }
   0xf   : > { %v1669_v7 = vld [vmem:[%s490_s17 + $0x18] sm:$0xff]  ;;  %v1672_v8 = vld [vmem:[%s490_s17 + $0x30] sm:$0xff]  ;;  %v1670_v12 = vld [vmem:[%s490_s17 + $0x20] sm:$0xff] }
  0x10   : > { %621 = vmatpush.bf16.msra.mxu0 %v1676_v1  ;;  %1693 = vmatpush.bf16.msra.mxu1 %v1676_v1  ;;  %v1673_v13 = vld [vmem:[%s490_s17 + $0x38] sm:$0xff]  ;;  %v1671_v14 = vld [vmem:[%s490_s17 + $0x28] sm:$0xff]  ;;  %v1885_v17 = vld [vmem:[%s2141_s2] ss:$0 sm:$0xff]  ;;  %s2087_s17 = scalar_lea.vmem %s2154_s15, %s1501_s27 }
  0x11   : > { %v1683_v18 = vld [vmem:[%s2144_s5 + $0x8] sm:$0xff]  ;;  %v1682_v46 = vld [vmem:[%s2144_s5] sm:$0xff] }
  0x12   : > { %1696 = vmatpush.bf16.msra.mxu2 %v1683_v18 }
  0x14   : > { %622 = vmatpush.bf16.msra.mxu0 %v1675_v2  ;;  %1694 = vmatpush.bf16.msra.mxu1 %v1675_v2 }
  0x16   : > { %1697 = vmatpush.bf16.msra.mxu2 %v1682_v46 }
  0x18   : > { %623 = vmatpush.bf16.msra.mxu0 %v1674_v3  ;;  %1695 = vmatpush.bf16.msra.mxu1 %v1674_v3 }
  0x1b   : > { %1552 = vmatmul.msk.bf16.vlgmr.msra.gmra.mxu0 %vm591_vm0, %v1666_v4  ;;  %1558 = vmatmul.msk.bf16.vlgmr.msra.gmra.mxu1 %vm591_vm0, %v1672_v8 }
  0x1c   : > { %753 = vmatpush.bf16.msrb.mxu1 %v1681_v9 }
  0x20   : > { %754 = vmatpush.bf16.msrb.mxu1 %v1680_v10 }
  0x24   : > { %755 = vmatpush.bf16.msrb.mxu1 %v1679_v11 }
  0x28   : > { %756 = vmatpush.bf16.msrb.mxu1 %v1678_v15 }
  0x2b   : > { %1553 = vmatmul.msk.bf16.gmra.mxu0 %vm591_vm0, %v1667_v5  ;;  %1559 = vmatmul.msk.bf16.gmra.mxu1 %vm591_vm0, %v1673_v13 }
  0x2c   : > { %873 = vmatpush.bf16.msra.mxu1 %v1683_v18 }
  0x30   : > { %874 = vmatpush.bf16.msra.mxu1 %v1682_v46 }
  0x3b   : > { %1554 = vmatmul.msk.bf16.gmra.mxu0 %vm591_vm0, %v1668_v6 }
  0x4b   : > { %1555 = vmatmul.msk.bf16.gmra.mxu0 %vm591_vm0, %v1669_v7 }
  0x5b   : > { %1556 = vmatmul.msk.bf16.gmra.mxu0 %vm591_vm0, %v1670_v12  ;;  %v1920_v12 = vld [vmem:[%s2143_s4] ss:$0 sm:$0xff] }
  0x6b   : > { %1557 = vmatmul.msk.bf16.gmra.mxu0 %vm591_vm0, %v1671_v14 }
  0x98   : > { %v625_v16 = vpop.f32.mrf.mxu0  ;;  %v655_v55 = vpop.f32.mrf.mxu1 }
  0x99   : > { %v626_v19 = vadd.f32 %v1885_v17, %v625_v16  ;;  %v656_v63 = vadd.f32 %v1885_v17, %v655_v55 }
  0x9b   : > { %v665_v22 = vmax.f32 %v626_v19, 0.0  ;;  %v677_v2 = vmax.f32 %v656_v63, 0.0  ;;  %v1684_v63 = vld [vmem:[%s2146_s7] sm:$0x30] }
  0xa0   : > { %v627_v20 = vpop.f32.mrf.mxu0  ;;  %v657_v62 = vpop.f32.mrf.mxu1 }
  0xa1   : > { %v628_v21 = vadd.f32 %v1885_v17, %v627_v20  ;;  %v658_v0 = vadd.f32 %v1885_v17, %v657_v62  ;;  %v1602_v62 = vld [vmem:[%s2146_s7] sm:$0xf] }
  0xa3   : > { %v666_v23 = vmax.f32 %v628_v21, 0.0  ;;  %v678_v3 = vmax.f32 %v658_v0, 0.0  ;;  %v1603_v0 = vor.u32 %v1684_v63, %v1602_v62 }
  0xa5   : > { %v681_v24 = vpack.c.bf16 %v666_v23, %v665_v22  ;;  %v687_v4 = vpack.c.bf16 %v678_v3, %v677_v2  ;;  %v978_v2 = vsel %vm976_vm2, %v1603_v0, 0 }
  0xa6   : > { %1698 = vmatpush.bf16.msra.mxu3 %v978_v2 }
  0xa7   : > { %1576 = vmatmul.msk.bf16.vlgmr.msrb.gmra.mxu1 %vm591_vm0, %v681_v24 }
  0xa8   : > { %v630_v25 = vpop.f32.mrf.mxu0  ;;  %v660_v1 = vpop.f32.mrf.mxu1  ;;  %987 = vmatpush.bf16.msrb.mxu1 %v978_v2 }
  0xa9   : > { %v631_v26 = vadd.f32 %v1885_v17, %v630_v25  ;;  %v661_v6 = vadd.f32 %v1885_v17, %v660_v1 }
  0xab   : > { %v667_v29 = vmax.f32 %v631_v26, 0.0  ;;  %v679_v8 = vmax.f32 %v661_v6, 0.0 }
  0xb0   : > { %v632_v27 = vpop.f32.mrf.mxu0  ;;  %v662_v5 = vpop.f32.mrf.mxu1 }
  0xb1   : > { %v633_v28 = vadd.f32 %v1885_v17, %v632_v27  ;;  %v663_v7 = vadd.f32 %v1885_v17, %v662_v5 }
  0xb3   : > { %v668_v30 = vmax.f32 %v633_v28, 0.0  ;;  %v680_v9 = vmax.f32 %v663_v7, 0.0 }
  0xb5   : > { %v682_v31 = vpack.c.bf16 %v668_v30, %v667_v29  ;;  %v688_v10 = vpack.c.bf16 %v680_v9, %v679_v8  ;;  %v1956_v9 = vld [vmem:[%s2145_s6] ss:$0 sm:$0xff] }
  0xb7   : > { %1577 = vmatmul.msk.bf16.gmra.mxu1 %vm591_vm0, %v682_v31 }
  0xb8   : > { %v635_v32 = vpop.f32.mrf.mxu0 }
  0xb9   : > { %v636_v33 = vadd.f32 %v1885_v17, %v635_v32 }
  0xbb   : > { %v669_v36 = vmax.f32 %v636_v33, 0.0 }
  0xc0   : > { %v637_v34 = vpop.f32.mrf.mxu0 }
  0xc1   : > { %v638_v35 = vadd.f32 %v1885_v17, %v637_v34 }
  0xc3   : > { %v670_v37 = vmax.f32 %v638_v35, 0.0 }
  0xc5   : > { %v683_v38 = vpack.c.bf16 %v670_v37, %v669_v36 }
  0xc7   : > { %1578 = vmatmul.msk.bf16.gmra.mxu1 %vm591_vm0, %v683_v38 }
  0xc8   : > { %v640_v39 = vpop.f32.mrf.mxu0 }
  0xc9   : > { %v641_v40 = vadd.f32 %v1885_v17, %v640_v39 }
  0xcb   : > { %v671_v43 = vmax.f32 %v641_v40, 0.0 }
  0xd0   : > { %v642_v41 = vpop.f32.mrf.mxu0 }
  0xd1   : > { %v643_v42 = vadd.f32 %v1885_v17, %v642_v41 }
  0xd3   : > { %v672_v44 = vmax.f32 %v643_v42, 0.0 }
  0xd5   : > { %v684_v45 = vpack.c.bf16 %v672_v44, %v671_v43 }
  0xd7   : > { %1579 = vmatmul.msk.bf16.gmra.mxu1 %vm591_vm0, %v684_v45 }
  0xd8   : > { %v645_v47 = vpop.f32.mrf.mxu0 }
  0xd9   : > { %v646_v48 = vadd.f32 %v1885_v17, %v645_v47 }
  0xdb   : > { %v673_v51 = vmax.f32 %v646_v48, 0.0 }
  0xe0   : > { %v647_v49 = vpop.f32.mrf.mxu0 }
  0xe1   : > { %v648_v50 = vadd.f32 %v1885_v17, %v647_v49 }
  0xe3   : > { %v674_v52 = vmax.f32 %v648_v50, 0.0 }
  0xe5   : > { %v685_v53 = vpack.c.bf16 %v674_v52, %v673_v51 }
  0xe7   : > { %1580 = vmatmul.msk.bf16.gmra.mxu1 %vm591_vm0, %v685_v53 }
  0xe8   : > { %v650_v54 = vpop.f32.mrf.mxu0 }
  0xe9   : > { %v651_v56 = vadd.f32 %v1885_v17, %v650_v54 }
  0xeb   : > { %v675_v59 = vmax.f32 %v651_v56, 0.0 }
  0xf0   : > { %v652_v57 = vpop.f32.mrf.mxu0 }
  0xf1   : > { %v653_v58 = vadd.f32 %v1885_v17, %v652_v57 }
  0xf3   : > { %v676_v60 = vmax.f32 %v653_v58, 0.0 }
  0xf5   : > { %v686_v61 = vpack.c.bf16 %v676_v60, %v675_v59 }
  0xf7   : > { %1581 = vmatmul.msk.bf16.gmra.mxu1 %vm591_vm0, %v686_v61 }
 0x107   : > { %1582 = vmatmul.msk.bf16.gmra.mxu1 %vm591_vm0, %v687_v4 }
 0x117   : > { %1583 = vmatmul.msk.bf16.gmra.mxu1 %vm591_vm0, %v688_v10 }
 0x124   : > { %v758_v11 = vpop.f32.mrf.mxu1 }
 0x125   : > { %v759_v13 = vadd.f32 %v1920_v12, %v758_v11 }
 0x127   : > { %v798_v16 = vmax.f32 %v759_v13, 0.0 }
 0x12c   : > { %v760_v14 = vpop.f32.mrf.mxu1 }
 0x12d   : > { %v761_v15 = vadd.f32 %v1920_v12, %v760_v14 }
 0x12f   : > { %v799_v18 = vmax.f32 %v761_v15, 0.0 }
 0x131   : > { %v814_v17 = vpack.c.bf16 %v799_v18, %v798_v16  ;;  %v1614_v18 = vld [vmem:[%s2148_s9] sm:$0xf] }
 0x133   : > { %1592 = vmatmul.msk.bf16.vlgmr.msra.gmra.mxu1 %vm842_vm1, %v814_v17  ;;  %v1685_v17 = vld [vmem:[%s2148_s9] sm:$0x30] }
 0x134   : > { %v763_v19 = vpop.f32.mrf.mxu1 }
 0x135   : > { %v764_v20 = vadd.f32 %v1920_v12, %v763_v19  ;;  %v1615_v19 = vor.u32 %v1685_v17, %v1614_v18 }
 0x137   : > { %v800_v23 = vmax.f32 %v764_v20, 0.0  ;;  %v1089_v20 = vsel %vm976_vm2, %v1615_v19, 0 }
 0x138   : > { %1098 = vmatpush.bf16.msrb.mxu3 %v1089_v20 }
 0x13c   : > { %v765_v21 = vpop.f32.mrf.mxu1 }
 0x13d   : > { %v766_v22 = vadd.f32 %v1920_v12, %v765_v21 }
 0x13f   : > { %v801_v24 = vmax.f32 %v766_v22, 0.0 }
 0x141   : > { %v815_v25 = vpack.c.bf16 %v801_v24, %v800_v23 }
 0x143   : > { %1593 = vmatmul.msk.bf16.vlgmr.msra.gmra.mxu2 %vm842_vm1, %v815_v25 }
 0x144   : > { %v768_v26 = vpop.f32.mrf.mxu1 }
 0x145   : > { %v769_v27 = vadd.f32 %v1920_v12, %v768_v26 }
 0x147   : > { %v802_v30 = vmax.f32 %v769_v27, 0.0 }
 0x14c   : > { %v770_v28 = vpop.f32.mrf.mxu1 }
 0x14d   : > { %v771_v29 = vadd.f32 %v1920_v12, %v770_v28 }
 0x14f   : > { %v803_v31 = vmax.f32 %v771_v29, 0.0 }
 0x151   : > { %v816_v32 = vpack.c.bf16 %v803_v31, %v802_v30 }
 0x153   : > { %1594 = vmatmul.msk.bf16.gmra.mxu2 %vm842_vm1, %v816_v32 }
 0x154   : > { %v773_v33 = vpop.f32.mrf.mxu1 }
 0x155   : > { %v774_v34 = vadd.f32 %v1920_v12, %v773_v33 }
 0x157   : > { %v804_v37 = vmax.f32 %v774_v34, 0.0 }
 0x15c   : > { %v775_v35 = vpop.f32.mrf.mxu1 }
 0x15d   : > { %v776_v36 = vadd.f32 %v1920_v12, %v775_v35 }
 0x15f   : > { %v805_v38 = vmax.f32 %v776_v36, 0.0 }
 0x161   : > { %v817_v39 = vpack.c.bf16 %v805_v38, %v804_v37 }
 0x163   : > { %1595 = vmatmul.msk.bf16.gmra.mxu2 %vm842_vm1, %v817_v39 }
 0x164   : > { %v778_v40 = vpop.f32.mrf.mxu1 }
 0x165   : > { %v779_v41 = vadd.f32 %v1920_v12, %v778_v40 }
 0x167   : > { %v806_v44 = vmax.f32 %v779_v41, 0.0 }
 0x16c   : > { %v780_v42 = vpop.f32.mrf.mxu1 }
 0x16d   : > { %v781_v43 = vadd.f32 %v1920_v12, %v780_v42 }
 0x16f   : > { %v807_v45 = vmax.f32 %v781_v43, 0.0 }
 0x171   : > { %v818_v46 = vpack.c.bf16 %v807_v45, %v806_v44 }
 0x173   : > { %1596 = vmatmul.msk.bf16.gmra.mxu2 %vm842_vm1, %v818_v46 }
 0x174   : > { %v783_v47 = vpop.f32.mrf.mxu1 }
 0x175   : > { %v784_v48 = vadd.f32 %v1920_v12, %v783_v47 }
 0x177   : > { %v808_v51 = vmax.f32 %v784_v48, 0.0 }
 0x17c   : > { %v785_v49 = vpop.f32.mrf.mxu1 }
 0x17d   : > { %v786_v50 = vadd.f32 %v1920_v12, %v785_v49 }
 0x17f   : > { %v809_v52 = vmax.f32 %v786_v50, 0.0 }
 0x181   : > { %v819_v53 = vpack.c.bf16 %v809_v52, %v808_v51 }
 0x183   : > { %1597 = vmatmul.msk.bf16.gmra.mxu2 %vm842_vm1, %v819_v53 }
 0x184   : > { %v788_v54 = vpop.f32.mrf.mxu1 }
 0x185   : > { %v789_v55 = vadd.f32 %v1920_v12, %v788_v54 }
 0x187   : > { %v810_v58 = vmax.f32 %v789_v55, 0.0 }
 0x18c   : > { %v790_v56 = vpop.f32.mrf.mxu1 }
 0x18d   : > { %v791_v57 = vadd.f32 %v1920_v12, %v790_v56 }
 0x18f   : > { %v811_v59 = vmax.f32 %v791_v57, 0.0 }
 0x191   : > { %v820_v60 = vpack.c.bf16 %v811_v59, %v810_v58 }
 0x193   : > { %1598 = vmatmul.msk.bf16.gmra.mxu2 %vm842_vm1, %v820_v60 }
 0x194   : > { %v793_v61 = vpop.f32.mrf.mxu1 }
 0x195   : > { %v794_v1 = vadd.f32 %v1920_v12, %v793_v61 }
 0x197   : > { %v812_v5 = vmax.f32 %v794_v1, 0.0 }
 0x19c   : > { %v795_v3 = vpop.f32.mrf.mxu1 }
 0x19d   : > { %v796_v4 = vadd.f32 %v1920_v12, %v795_v3 }
 0x19f   : > { %v813_v6 = vmax.f32 %v796_v4, 0.0 }
 0x1a1   : > { %v821_v7 = vpack.c.bf16 %v813_v6, %v812_v5  ;;  %v1992_v6 = vld [vmem:[%s2147_s8] ss:$0 sm:$0xff] }
 0x1a3   : > { %1599 = vmatmul.msk.bf16.gmra.mxu2 %vm842_vm1, %v821_v7 }
 0x1b0   : > { %v876_v8 = vpop.f32.mrf.mxu1 }
 0x1b1   : > { %v877_v10 = vadd.f32 %v1956_v9, %v876_v8 }
 0x1b3   : > { %v916_v14 = vmax.f32 %v877_v10, 0.0 }
 0x1b8   : > { %v878_v11 = vpop.f32.mrf.mxu1 }
 0x1b9   : > { %v879_v13 = vadd.f32 %v1956_v9, %v878_v11 }
 0x1bb   : > { %v917_v15 = vmax.f32 %v879_v13, 0.0 }
 0x1bd   : > { %v932_v12 = vpack.c.bf16 %v917_v15, %v916_v14  ;;  %v1687_v15 = vld [vmem:[%s2150_s11 + $0x8] sm:$0xff] }
 0x1be   : > { %1214 = vmatpush.bf16.msrb.mxu2 %v1687_v15 }
 0x1bf   : > { %1604 = vmatmul.msk.bf16.vlgmr.msrb.gmra.mxu1 %vm951_vm3, %v932_v12 }
 0x1c6   : > { %v881_v16 = vpop.f32.mrf.mxu2 }
 0x1c7   : > { %v882_v21 = vadd.f32 %v1956_v9, %v881_v16 }
 0x1c9   : > { %v918_v24 = vmax.f32 %v882_v21, 0.0 }
 0x1ce   : > { %v883_v22 = vpop.f32.mrf.mxu2 }
 0x1cf   : > { %v884_v23 = vadd.f32 %v1956_v9, %v883_v22 }
 0x1d1   : > { %v919_v25 = vmax.f32 %v884_v23, 0.0 }
 0x1d3   : > { %v933_v26 = vpack.c.bf16 %v919_v25, %v918_v24 }
 0x1d5   : > { %1605 = vmatmul.msk.bf16.vlgmr.msra.gmra.mxu3 %vm951_vm3, %v933_v26 }
 0x1d6   : > { %v886_v27 = vpop.f32.mrf.mxu2 }
 0x1d7   : > { %v887_v28 = vadd.f32 %v1956_v9, %v886_v27 }
 0x1d9   : > { %v920_v31 = vmax.f32 %v887_v28, 0.0 }
 0x1de   : > { %v888_v29 = vpop.f32.mrf.mxu2 }
 0x1df   : > { %v889_v30 = vadd.f32 %v1956_v9, %v888_v29 }
 0x1e1   : > { %v921_v32 = vmax.f32 %v889_v30, 0.0 }
 0x1e3   : > { %v934_v33 = vpack.c.bf16 %v921_v32, %v920_v31 }
 0x1e5   : > { %1606 = vmatmul.msk.bf16.gmra.mxu3 %vm951_vm3, %v934_v33 }
 0x1e6   : > { %v891_v34 = vpop.f32.mrf.mxu2 }
 0x1e7   : > { %v892_v35 = vadd.f32 %v1956_v9, %v891_v34 }
 0x1e9   : > { %v922_v38 = vmax.f32 %v892_v35, 0.0 }
 0x1ee   : > { %v893_v36 = vpop.f32.mrf.mxu2 }
 0x1ef   : > { %v894_v37 = vadd.f32 %v1956_v9, %v893_v36 }
 0x1f1   : > { %v923_v39 = vmax.f32 %v894_v37, 0.0 }
 0x1f3   : > { %v935_v40 = vpack.c.bf16 %v923_v39, %v922_v38 }
 0x1f5   : > { %1607 = vmatmul.msk.bf16.gmra.mxu3 %vm951_vm3, %v935_v40 }
 0x1f6   : > { %v896_v41 = vpop.f32.mrf.mxu2 }
 0x1f7   : > { %v897_v42 = vadd.f32 %v1956_v9, %v896_v41 }
 0x1f9   : > { %v924_v45 = vmax.f32 %v897_v42, 0.0  ;;  %v1686_v42 = vld [vmem:[%s2150_s11] sm:$0xff] }
 0x1fa   : > { %1215 = vmatpush.bf16.msrb.mxu2 %v1686_v42 }
 0x1fe   : > { %v898_v43 = vpop.f32.mrf.mxu2 }
 0x1ff   : > { %v899_v44 = vadd.f32 %v1956_v9, %v898_v43 }
 0x201   : > { %v925_v46 = vmax.f32 %v899_v44, 0.0 }
 0x203   : > { %v936_v47 = vpack.c.bf16 %v925_v46, %v924_v45 }
 0x205   : > { %1608 = vmatmul.msk.bf16.gmra.mxu3 %vm951_vm3, %v936_v47 }
 0x206   : > { %v901_v48 = vpop.f32.mrf.mxu2 }
 0x207   : > { %v902_v49 = vadd.f32 %v1956_v9, %v901_v48 }
 0x209   : > { %v926_v52 = vmax.f32 %v902_v49, 0.0 }
 0x20e   : > { %v903_v50 = vpop.f32.mrf.mxu2 }
 0x20f   : > { %v904_v51 = vadd.f32 %v1956_v9, %v903_v50 }
 0x211   : > { %v927_v53 = vmax.f32 %v904_v51, 0.0 }
 0x213   : > { %v937_v54 = vpack.c.bf16 %v927_v53, %v926_v52 }
 0x215   : > { %1609 = vmatmul.msk.bf16.gmra.mxu3 %vm951_vm3, %v937_v54 }
 0x216   : > { %v906_v55 = vpop.f32.mrf.mxu2 }
 0x217   : > { %v907_v56 = vadd.f32 %v1956_v9, %v906_v55 }
 0x219   : > { %v928_v59 = vmax.f32 %v907_v56, 0.0 }
 0x21e   : > { %v908_v57 = vpop.f32.mrf.mxu2 }
 0x21f   : > { %v909_v58 = vadd.f32 %v1956_v9, %v908_v57 }
 0x221   : > { %v929_v60 = vmax.f32 %v909_v58, 0.0 }
 0x223   : > { %v938_v61 = vpack.c.bf16 %v929_v60, %v928_v59 }
 0x225   : > { %1610 = vmatmul.msk.bf16.gmra.mxu3 %vm951_vm3, %v938_v61 }
 0x226   : > { %v911_v62 = vpop.f32.mrf.mxu2 }
 0x227   : > { %v912_v63 = vadd.f32 %v1956_v9, %v911_v62 }
 0x229   : > { %v930_v2 = vmax.f32 %v912_v63, 0.0 }
 0x22e   : > { %v913_v0 = vpop.f32.mrf.mxu2 }
 0x22f   : > { %v914_v1 = vadd.f32 %v1956_v9, %v913_v0 }
 0x231   : > { %v931_v3 = vmax.f32 %v914_v1, 0.0  ;;  %v2027_v1 = vld [vmem:[%s2149_s10] ss:$0 sm:$0xff] }
 0x233   : > { %v939_v4 = vpack.c.bf16 %v931_v3, %v930_v2 }
 0x235   : > { %1611 = vmatmul.msk.bf16.gmra.mxu3 %vm951_vm3, %v939_v4 }
 0x23c   : > { %v989_v5 = vpop.f32.mrf.mxu1 }
 0x23d   : > { %v990_v7 = vadd.f32 %v1992_v6, %v989_v5 }
 0x23f   : > { %v1029_v11 = vmax.f32 %v990_v7, 0.0 }
 0x244   : > { %v991_v8 = vpop.f32.mrf.mxu1 }
 0x245   : > { %v992_v10 = vadd.f32 %v1992_v6, %v991_v8 }
 0x247   : > { %v1030_v13 = vmax.f32 %v992_v10, 0.0 }
 0x249   : > { %v1045_v14 = vpack.c.bf16 %v1030_v13, %v1029_v11 }
 0x24b   : > { %1616 = vmatmul.msk.bf16.vlgmr.msrb.gmra.mxu3 %vm951_vm3, %v1045_v14 }
 0x258   : > { %v994_v9 = vpop.f32.mrf.mxu3 }
 0x259   : > { %v995_v12 = vadd.f32 %v1992_v6, %v994_v9 }
 0x25b   : > { %v1031_v17 = vmax.f32 %v995_v12, 0.0 }
 0x260   : > { %v996_v16 = vpop.f32.mrf.mxu3 }
 0x261   : > { %v997_v18 = vadd.f32 %v1992_v6, %v996_v16  ;;  %v1691_v16 = vld [vmem:[%s2152_s13 + $0x18] sm:$0xff] }
 0x262   : > { %1345 = vmatpush.bf16.msrb.mxu0 %v1691_v16 }
 0x263   : > { %v1032_v19 = vmax.f32 %v997_v18, 0.0 }
 0x265   : > { %v1046_v20 = vpack.c.bf16 %v1032_v19, %v1031_v17 }
 0x267   : > { %1617 = vmatmul.msk.bf16.gmra.mxu3 %vm951_vm3, %v1046_v20 }
 0x268   : > { %v999_v21 = vpop.f32.mrf.mxu3 }
 0x269   : > { %v1000_v22 = vadd.f32 %v1992_v6, %v999_v21 }
 0x26b   : > { %v1033_v25 = vmax.f32 %v1000_v22, 0.0 }
 0x270   : > { %v1001_v23 = vpop.f32.mrf.mxu3 }
 0x271   : > { %v1002_v24 = vadd.f32 %v1992_v6, %v1001_v23 }
 0x273   : > { %v1034_v26 = vmax.f32 %v1002_v24, 0.0 }
 0x275   : > { %v1047_v27 = vpack.c.bf16 %v1034_v26, %v1033_v25 }
 0x277   : > { %1618 = vmatmul.msk.bf16.gmra.mxu3 %vm951_vm3, %v1047_v27 }
 0x278   : > { %v1004_v28 = vpop.f32.mrf.mxu3 }
 0x279   : > { %v1005_v29 = vadd.f32 %v1992_v6, %v1004_v28 }
 0x27b   : > { %v1035_v32 = vmax.f32 %v1005_v29, 0.0 }
 0x280   : > { %v1006_v30 = vpop.f32.mrf.mxu3 }
 0x281   : > { %v1007_v31 = vadd.f32 %v1992_v6, %v1006_v30  ;;  %v1690_v30 = vld [vmem:[%s2152_s13 + $0x10] sm:$0xff] }
 0x282   : > { %1346 = vmatpush.bf16.msrb.mxu0 %v1690_v30 }
 0x283   : > { %v1036_v33 = vmax.f32 %v1007_v31, 0.0 }
 0x285   : > { %v1048_v34 = vpack.c.bf16 %v1036_v33, %v1035_v32 }
 0x287   : > { %1619 = vmatmul.msk.bf16.gmra.mxu3 %vm951_vm3, %v1048_v34 }
 0x288   : > { %v1009_v35 = vpop.f32.mrf.mxu3 }
 0x289   : > { %v1010_v36 = vadd.f32 %v1992_v6, %v1009_v35 }
 0x28b   : > { %v1037_v39 = vmax.f32 %v1010_v36, 0.0 }
 0x290   : > { %v1011_v37 = vpop.f32.mrf.mxu3 }
 0x291   : > { %v1012_v38 = vadd.f32 %v1992_v6, %v1011_v37 }
 0x293   : > { %v1038_v40 = vmax.f32 %v1012_v38, 0.0 }
 0x295   : > { %v1049_v41 = vpack.c.bf16 %v1038_v40, %v1037_v39  ;;  %v1689_v39 = vld [vmem:[%s2152_s13 + $0x8] sm:$0xff] }
 0x296   : > { %1347 = vmatpush.bf16.msrb.mxu0 %v1689_v39 }
 0x297   : > { %1620 = vmatmul.msk.bf16.gmra.mxu3 %vm951_vm3, %v1049_v41 }
 0x298   : > { %v1014_v43 = vpop.f32.mrf.mxu3 }
 0x299   : > { %v1015_v44 = vadd.f32 %v1992_v6, %v1014_v43 }
 0x29b   : > { %v1039_v47 = vmax.f32 %v1015_v44, 0.0 }
 0x2a0   : > { %v1016_v45 = vpop.f32.mrf.mxu3 }
 0x2a1   : > { %v1017_v46 = vadd.f32 %v1992_v6, %v1016_v45 }
 0x2a3   : > { %v1040_v48 = vmax.f32 %v1017_v46, 0.0 }
 0x2a5   : > { %v1050_v49 = vpack.c.bf16 %v1040_v48, %v1039_v47 }
 0x2a7   : > { %1621 = vmatmul.msk.bf16.gmra.mxu3 %vm951_vm3, %v1050_v49 }
 0x2a8   : > { %v1019_v50 = vpop.f32.mrf.mxu3 }
 0x2a9   : > { %v1020_v51 = vadd.f32 %v1992_v6, %v1019_v50  ;;  %v1688_v50 = vld [vmem:[%s2152_s13] sm:$0xff] }
 0x2aa   : > { %1348 = vmatpush.bf16.msrb.mxu0 %v1688_v50 }
 0x2ab   : > { %v1041_v54 = vmax.f32 %v1020_v51, 0.0 }
 0x2b0   : > { %v1021_v52 = vpop.f32.mrf.mxu3 }
 0x2b1   : > { %v1022_v53 = vadd.f32 %v1992_v6, %v1021_v52 }
 0x2b3   : > { %v1042_v55 = vmax.f32 %v1022_v53, 0.0 }
 0x2b5   : > { %v1051_v56 = vpack.c.bf16 %v1042_v55, %v1041_v54 }
 0x2b7   : > { %1622 = vmatmul.msk.bf16.gmra.mxu3 %vm951_vm3, %v1051_v56 }
 0x2b8   : > { %v1024_v57 = vpop.f32.mrf.mxu3 }
 0x2b9   : > { %v1025_v58 = vadd.f32 %v1992_v6, %v1024_v57 }
 0x2bb   : > { %v1043_v61 = vmax.f32 %v1025_v58, 0.0 }
 0x2c0   : > { %v1026_v59 = vpop.f32.mrf.mxu3 }
 0x2c1   : > { %v1027_v60 = vadd.f32 %v1992_v6, %v1026_v59 }
 0x2c3   : > { %v1044_v62 = vmax.f32 %v1027_v60, 0.0 }
 0x2c5   : > { %v1052_v63 = vpack.c.bf16 %v1044_v62, %v1043_v61  ;;  %v1712_v62 = vld [vmem:[%s2151_s12] ss:$0 sm:$0xff] }
 0x2c7   : > { %1623 = vmatmul.msk.bf16.gmra.mxu3 %vm951_vm3, %v1052_v63 }
 0x2ce   : > { %v1100_v0 = vpop.f32.mrf.mxu3 }
 0x2cf   : > { %v1101_v2 = vadd.f32 %v2027_v1, %v1100_v0 }
 0x2d1   : > { %v1140_v5 = vmax.f32 %v1101_v2, 0.0 }
 0x2d6   : > { %v1102_v3 = vpop.f32.mrf.mxu3 }
 0x2d7   : > { %v1103_v4 = vadd.f32 %v2027_v1, %v1102_v3 }
 0x2d9   : > { %v1141_v7 = vmax.f32 %v1103_v4, 0.0 }
 0x2db   : > { %v1156_v8 = vpack.c.bf16 %v1141_v7, %v1140_v5 }
 0x2dd   : > { %1632 = vmatmul.msk.bf16.vlgmr.msrb.gmra.mxu2 %vm842_vm1, %v1156_v8 }
 0x2ea   : > { %v1105_v6 = vpop.f32.mrf.mxu3 }
 0x2eb   : > { %v1106_v10 = vadd.f32 %v2027_v1, %v1105_v6 }
 0x2ed   : > { %v1142_v14 = vmax.f32 %v1106_v10, 0.0 }
 0x2f2   : > { %v1107_v11 = vpop.f32.mrf.mxu3 }
 0x2f3   : > { %v1108_v13 = vadd.f32 %v2027_v1, %v1107_v11 }
 0x2f5   : > { %v1143_v9 = vmax.f32 %v1108_v13, 0.0 }
 0x2f7   : > { %v1157_v15 = vpack.c.bf16 %v1143_v9, %v1142_v14 }
 0x2f9   : > { %1633 = vmatmul.msk.bf16.gmra.mxu2 %vm842_vm1, %v1157_v15 }
 0x2fa   : > { %v1110_v12 = vpop.f32.mrf.mxu3 }
 0x2fb   : > { %v1111_v18 = vadd.f32 %v2027_v1, %v1110_v12 }
 0x2fd   : > { %v1144_v20 = vmax.f32 %v1111_v18, 0.0 }
 0x302   : > { %v1112_v17 = vpop.f32.mrf.mxu3 }
 0x303   : > { %v1113_v19 = vadd.f32 %v2027_v1, %v1112_v17 }
 0x305   : > { %v1145_v21 = vmax.f32 %v1113_v19, 0.0 }
 0x307   : > { %v1158_v22 = vpack.c.bf16 %v1145_v21, %v1144_v20 }
 0x309   : > { %1634 = vmatmul.msk.bf16.gmra.mxu2 %vm842_vm1, %v1158_v22 }
 0x30a   : > { %v1115_v23 = vpop.f32.mrf.mxu3 }
 0x30b   : > { %v1116_v24 = vadd.f32 %v2027_v1, %v1115_v23 }
 0x30d   : > { %v1146_v27 = vmax.f32 %v1116_v24, 0.0 }
 0x312   : > { %v1117_v25 = vpop.f32.mrf.mxu3 }
 0x313   : > { %v1118_v26 = vadd.f32 %v2027_v1, %v1117_v25 }
 0x315   : > { %v1147_v28 = vmax.f32 %v1118_v26, 0.0 }
 0x317   : > { %v1159_v29 = vpack.c.bf16 %v1147_v28, %v1146_v27 }
 0x319   : > { %1635 = vmatmul.msk.bf16.gmra.mxu2 %vm842_vm1, %v1159_v29 }
 0x31a   : > { %v1120_v31 = vpop.f32.mrf.mxu3 }
 0x31b   : > { %v1121_v32 = vadd.f32 %v2027_v1, %v1120_v31 }
 0x31d   : > { %v1148_v35 = vmax.f32 %v1121_v32, 0.0 }
 0x322   : > { %v1122_v33 = vpop.f32.mrf.mxu3 }
 0x323   : > { %v1123_v34 = vadd.f32 %v2027_v1, %v1122_v33 }
 0x325   : > { %v1149_v36 = vmax.f32 %v1123_v34, 0.0 }
 0x327   : > { %v1160_v37 = vpack.c.bf16 %v1149_v36, %v1148_v35 }
 0x329   : > { %1636 = vmatmul.msk.bf16.gmra.mxu2 %vm842_vm1, %v1160_v37 }
 0x32a   : > { %v1125_v38 = vpop.f32.mrf.mxu3 }
 0x32b   : > { %v1126_v40 = vadd.f32 %v2027_v1, %v1125_v38 }
 0x32d   : > { %v1150_v43 = vmax.f32 %v1126_v40, 0.0 }
 0x332   : > { %v1127_v41 = vpop.f32.mrf.mxu3 }
 0x333   : > { %v1128_v42 = vadd.f32 %v2027_v1, %v1127_v41 }
 0x335   : > { %v1151_v44 = vmax.f32 %v1128_v42, 0.0 }
 0x337   : > { %v1161_v45 = vpack.c.bf16 %v1151_v44, %v1150_v43 }
 0x339   : > { %1637 = vmatmul.msk.bf16.gmra.mxu2 %vm842_vm1, %v1161_v45 }
 0x33a   : > { %v1130_v46 = vpop.f32.mrf.mxu3 }
 0x33b   : > { %v1131_v47 = vadd.f32 %v2027_v1, %v1130_v46 }
 0x33d   : > { %v1152_v51 = vmax.f32 %v1131_v47, 0.0 }
 0x342   : > { %v1132_v48 = vpop.f32.mrf.mxu3 }
 0x343   : > { %v1133_v49 = vadd.f32 %v2027_v1, %v1132_v48 }
 0x345   : > { %v1153_v52 = vmax.f32 %v1133_v49, 0.0 }
 0x347   : > { %v1162_v53 = vpack.c.bf16 %v1153_v52, %v1152_v51 }
 0x349   : > { %1638 = vmatmul.msk.bf16.gmra.mxu2 %vm842_vm1, %v1162_v53 }
 0x34a   : > { %v1135_v54 = vpop.f32.mrf.mxu3 }
 0x34b   : > { %v1136_v55 = vadd.f32 %v2027_v1, %v1135_v54  ;;  %v2078_v54 = vld [vmem:[%s2153_s14] ss:$0 sm:$0xff] }
 0x34d   : > { %v1154_v58 = vmax.f32 %v1136_v55, 0.0 }
 0x352   : > { %v1137_v56 = vpop.f32.mrf.mxu3 }
 0x353   : > { %v1138_v57 = vadd.f32 %v2027_v1, %v1137_v56 }
 0x355   : > { %v1155_v59 = vmax.f32 %v1138_v57, 0.0 }
 0x357   : > { %v1163_v60 = vpack.c.bf16 %v1155_v59, %v1154_v58 }
 0x359   : > { %1639 = vmatmul.msk.bf16.gmra.mxu2 %vm842_vm1, %v1163_v60 }
 0x360   : > { %v1217_v61 = vpop.f32.mrf.mxu2 }
 0x361   : > { %v1218_v63 = vadd.f32 %v1712_v62, %v1217_v61 }
 0x363   : > { %v1257_v3 = vmax.f32 %v1218_v63, 0.0 }
 0x368   : > { %v1219_v0 = vpop.f32.mrf.mxu2 }
 0x369   : > { %v1220_v2 = vadd.f32 %v1712_v62, %v1219_v0 }
 0x36b   : > { %v1258_v4 = vmax.f32 %v1220_v2, 0.0 }
 0x36d   : > { %v1273_v5 = vpack.c.bf16 %v1258_v4, %v1257_v3 }
 0x36f   : > { %1656 = vmatmul.msk.bf16.vlgmr.msrb.gmra.mxu0 %vm591_vm0, %v1273_v5 }
 0x37c   : > { %v1222_v7 = vpop.f32.mrf.mxu2 }
 0x37d   : > { %v1223_v1 = vadd.f32 %v1712_v62, %v1222_v7 }
 0x37f   : > { %v1259_v10 = vmax.f32 %v1223_v1, 0.0 }
 0x384   : > { %v1224_v8 = vpop.f32.mrf.mxu2 }
 0x385   : > { %v1225_v6 = vadd.f32 %v1712_v62, %v1224_v8 }
 0x387   : > { %v1260_v11 = vmax.f32 %v1225_v6, 0.0 }
 0x389   : > { %v1274_v13 = vpack.c.bf16 %v1260_v11, %v1259_v10 }
 0x38b   : > { %1657 = vmatmul.msk.bf16.gmra.mxu0 %vm591_vm0, %v1274_v13 }
 0x38c   : > { %v1227_v14 = vpop.f32.mrf.mxu2 }
 0x38d   : > { %v1228_v9 = vadd.f32 %v1712_v62, %v1227_v14 }
 0x38f   : > { %v1261_v16 = vmax.f32 %v1228_v9, 0.0 }
 0x394   : > { %v1229_v15 = vpop.f32.mrf.mxu2 }
 0x395   : > { %v1230_v12 = vadd.f32 %v1712_v62, %v1229_v15 }
 0x397   : > { %v1262_v18 = vmax.f32 %v1230_v12, 0.0 }
 0x399   : > { %v1275_v17 = vpack.c.bf16 %v1262_v18, %v1261_v16 }
 0x39b   : > { %1658 = vmatmul.msk.bf16.gmra.mxu0 %vm591_vm0, %v1275_v17 }
 0x39c   : > { %v1232_v19 = vpop.f32.mrf.mxu2 }
 0x39d   : > { %v1233_v20 = vadd.f32 %v1712_v62, %v1232_v19 }
 0x39f   : > { %v1263_v23 = vmax.f32 %v1233_v20, 0.0 }
 0x3a4   : > { %v1234_v21 = vpop.f32.mrf.mxu2 }
 0x3a5   : > { %v1235_v22 = vadd.f32 %v1712_v62, %v1234_v21 }
 0x3a7   : > { %v1264_v24 = vmax.f32 %v1235_v22, 0.0 }
 0x3a9   : > { %v1276_v25 = vpack.c.bf16 %v1264_v24, %v1263_v23 }
 0x3ab   : > { %1659 = vmatmul.msk.bf16.gmra.mxu0 %vm591_vm0, %v1276_v25 }
 0x3ac   : > { %v1237_v26 = vpop.f32.mrf.mxu2 }
 0x3ad   : > { %v1238_v27 = vadd.f32 %v1712_v62, %v1237_v26 }
 0x3af   : > { %v1265_v30 = vmax.f32 %v1238_v27, 0.0 }
 0x3b4   : > { %v1239_v28 = vpop.f32.mrf.mxu2 }
 0x3b5   : > { %v1240_v29 = vadd.f32 %v1712_v62, %v1239_v28 }
 0x3b7   : > { %v1266_v31 = vmax.f32 %v1240_v29, 0.0 }
 0x3b9   : > { %v1277_v32 = vpack.c.bf16 %v1266_v31, %v1265_v30 }
 0x3bb   : > { %1660 = vmatmul.msk.bf16.gmra.mxu0 %vm591_vm0, %v1277_v32 }
 0x3bc   : > { %v1242_v33 = vpop.f32.mrf.mxu2 }
 0x3bd   : > { %v1243_v34 = vadd.f32 %v1712_v62, %v1242_v33 }
 0x3bf   : > { %v1267_v37 = vmax.f32 %v1243_v34, 0.0 }
 0x3c4   : > { %v1244_v35 = vpop.f32.mrf.mxu2 }
 0x3c5   : > { %v1245_v36 = vadd.f32 %v1712_v62, %v1244_v35 }
 0x3c7   : > { %v1268_v38 = vmax.f32 %v1245_v36, 0.0 }
 0x3c9   : > { %v1278_v39 = vpack.c.bf16 %v1268_v38, %v1267_v37 }
 0x3cb   : > { %1661 = vmatmul.msk.bf16.gmra.mxu0 %vm591_vm0, %v1278_v39 }
 0x3cc   : > { %v1247_v40 = vpop.f32.mrf.mxu2 }
 0x3cd   : > { %v1248_v41 = vadd.f32 %v1712_v62, %v1247_v40 }
 0x3cf   : > { %v1269_v44 = vmax.f32 %v1248_v41, 0.0 }
 0x3d4   : > { %v1249_v42 = vpop.f32.mrf.mxu2 }
 0x3d5   : > { %v1250_v43 = vadd.f32 %v1712_v62, %v1249_v42 }
 0x3d7   : > { %v1270_v45 = vmax.f32 %v1250_v43, 0.0 }
 0x3d9   : > { %v1279_v46 = vpack.c.bf16 %v1270_v45, %v1269_v44 }
 0x3db   : > { %1662 = vmatmul.msk.bf16.gmra.mxu0 %vm591_vm0, %v1279_v46 }
 0x3dc   : > { %v1252_v47 = vpop.f32.mrf.mxu2 }
 0x3dd   : > { %v1253_v48 = vadd.f32 %v1712_v62, %v1252_v47 }
 0x3df   : > { %v1271_v51 = vmax.f32 %v1253_v48, 0.0 }
 0x3e4   : > { %v1254_v49 = vpop.f32.mrf.mxu2 }
 0x3e5   : > { %v1255_v50 = vadd.f32 %v1712_v62, %v1254_v49 }
 0x3e7   : > { %v1272_v52 = vmax.f32 %v1255_v50, 0.0 }
 0x3e9   : > { %v1280_v53 = vpack.c.bf16 %v1272_v52, %v1271_v51 }
 0x3eb   : > { %1663 = vmatmul.msk.bf16.gmra.mxu0 %vm591_vm0, %v1280_v53 }
 0x3ec   : > { %v1350_v55 = vpop.f32.mrf.mxu0 }
 0x3ed   : > { %v1351_v56 = vadd.f32 %v2078_v54, %v1350_v55 }
 0x3ef   : > { %1714 = vtanh.f32 %v1351_v56 }
 0x3f4   : > { %v1352_v57 = vpop.f32.mrf.mxu0 }
 0x3f5   : > { %v1715_v58 = vpop.eup %1714  ;;  %v1353_v59 = vadd.f32 %v2078_v54, %v1352_v57 }
 0x3f6   : > { %v1406_v60 = vpack.c.bf16 %v1715_v58, %v1715_v58 }
 0x3f7   : > { %1716 = vtanh.f32 %v1353_v59 }
 0x3f8   : > { %1423 = vst.msk [vmem:[%s2087_s17] sm:$0xf] %vm1422_vm4, %v1406_v60 }
 0x3fd   : > { %v1717_v61 = vpop.eup %1716 }
 0x3fe   : > { %v1407_v62 = vpack.c.bf16 %v1717_v61, %v1717_v61 }
 0x400   : > { %1424 = vst.msk [vmem:[%s2087_s17 + $0x4] sm:$0xf] %vm1422_vm4, %v1407_v62 }
 0x408   : > { %v1355_v63 = vpop.f32.mrf.mxu0 }
 0x409   : > { %v1356_v0 = vadd.f32 %v2078_v54, %v1355_v63 }
 0x40b   : > { %1718 = vtanh.f32 %v1356_v0 }
 0x410   : > { %v1357_v2 = vpop.f32.mrf.mxu0 }
 0x411   : > { %v1719_v3 = vpop.eup %1718  ;;  %v1358_v4 = vadd.f32 %v2078_v54, %v1357_v2 }
 0x412   : > { %v1408_v5 = vpack.c.bf16 %v1719_v3, %v1719_v3 }
 0x413   : > { %1720 = vtanh.f32 %v1358_v4 }
 0x414   : > { %1425 = vst.msk [vmem:[%s2087_s17 + $0x8] sm:$0xf] %vm1422_vm4, %v1408_v5 }
 0x418   : > { %v1360_v7 = vpop.f32.mrf.mxu0 }
 0x419   : > { %v1721_v1 = vpop.eup %1720  ;;  %v1361_v8 = vadd.f32 %v2078_v54, %v1360_v7 }
 0x41a   : > { %v1409_v6 = vpack.c.bf16 %v1721_v1, %v1721_v1 }
 0x41b   : > { %1722 = vtanh.f32 %v1361_v8 }
 0x41c   : > { %1426 = vst.msk [vmem:[%s2087_s17 + $0xc] sm:$0xf] %vm1422_vm4, %v1409_v6 }
 0x420   : > { %v1362_v10 = vpop.f32.mrf.mxu0 }
 0x421   : > { %v1723_v11 = vpop.eup %1722  ;;  %v1363_v13 = vadd.f32 %v2078_v54, %v1362_v10 }
 0x422   : > { %v1410_v14 = vpack.c.bf16 %v1723_v11, %v1723_v11 }
 0x423   : > { %1724 = vtanh.f32 %v1363_v13 }
 0x424   : > { %1427 = vst.msk [vmem:[%s2087_s17 + $0x10] sm:$0xf] %vm1422_vm4, %v1410_v14 }
 0x428   : > { %v1365_v9 = vpop.f32.mrf.mxu0 }
 0x429   : > { %v1725_v15 = vpop.eup %1724  ;;  %v1366_v12 = vadd.f32 %v2078_v54, %v1365_v9 }
 0x42a   : > { %v1411_v16 = vpack.c.bf16 %v1725_v15, %v1725_v15 }
 0x42b   : > { %1726 = vtanh.f32 %v1366_v12 }
 0x42c   : > { %1428 = vst.msk [vmem:[%s2087_s17 + $0x14] sm:$0xf] %vm1422_vm4, %v1411_v16 }
 0x430   : > { %v1367_v18 = vpop.f32.mrf.mxu0 }
 0x431   : > { %v1727_v17 = vpop.eup %1726  ;;  %v1368_v19 = vadd.f32 %v2078_v54, %v1367_v18 }
 0x432   : > { %v1412_v20 = vpack.c.bf16 %v1727_v17, %v1727_v17 }
 0x433   : > { %1728 = vtanh.f32 %v1368_v19 }
 0x434   : > { %1429 = vst.msk [vmem:[%s2087_s17 + $0x18] sm:$0xf] %vm1422_vm4, %v1412_v20 }
 0x438   : > { %v1370_v21 = vpop.f32.mrf.mxu0 }
 0x439   : > { %v1729_v22 = vpop.eup %1728  ;;  %v1371_v23 = vadd.f32 %v2078_v54, %v1370_v21 }
 0x43a   : > { %v1413_v24 = vpack.c.bf16 %v1729_v22, %v1729_v22 }
 0x43b   : > { %1730 = vtanh.f32 %v1371_v23 }
 0x43c   : > { %1430 = vst.msk [vmem:[%s2087_s17 + $0x1c] sm:$0xf] %vm1422_vm4, %v1413_v24 }
 0x440   : > { %v1372_v25 = vpop.f32.mrf.mxu0 }
 0x441   : > { %v1731_v26 = vpop.eup %1730  ;;  %v1373_v27 = vadd.f32 %v2078_v54, %v1372_v25 }
 0x442   : > { %v1414_v28 = vpack.c.bf16 %v1731_v26, %v1731_v26 }
 0x443   : > { %1732 = vtanh.f32 %v1373_v27 }
 0x444   : > { %1431 = vst.msk [vmem:[%s2087_s17 + $0x20] sm:$0xf] %vm1422_vm4, %v1414_v28 }
 0x448   : > { %v1375_v29 = vpop.f32.mrf.mxu0 }
 0x449   : > { %v1733_v30 = vpop.eup %1732  ;;  %v1376_v31 = vadd.f32 %v2078_v54, %v1375_v29 }
 0x44a   : > { %v1415_v32 = vpack.c.bf16 %v1733_v30, %v1733_v30 }
 0x44b   : > { %1734 = vtanh.f32 %v1376_v31 }
 0x44c   : > { %1432 = vst.msk [vmem:[%s2087_s17 + $0x24] sm:$0xf] %vm1422_vm4, %v1415_v32 }
 0x450   : > { %v1377_v33 = vpop.f32.mrf.mxu0 }
 0x451   : > { %v1735_v34 = vpop.eup %1734  ;;  %v1378_v35 = vadd.f32 %v2078_v54, %v1377_v33 }
 0x452   : > { %v1416_v36 = vpack.c.bf16 %v1735_v34, %v1735_v34 }
 0x453   : > { %1736 = vtanh.f32 %v1378_v35 }
 0x454   : > { %1433 = vst.msk [vmem:[%s2087_s17 + $0x28] sm:$0xf] %vm1422_vm4, %v1416_v36 }
 0x458   : > { %v1380_v37 = vpop.f32.mrf.mxu0 }
 0x459   : > { %v1737_v38 = vpop.eup %1736  ;;  %v1381_v39 = vadd.f32 %v2078_v54, %v1380_v37 }
 0x45a   : > { %v1417_v40 = vpack.c.bf16 %v1737_v38, %v1737_v38 }
 0x45b   : > { %1738 = vtanh.f32 %v1381_v39 }
 0x45c   : > { %1434 = vst.msk [vmem:[%s2087_s17 + $0x2c] sm:$0xf] %vm1422_vm4, %v1417_v40 }
 0x460   : > { %v1382_v41 = vpop.f32.mrf.mxu0 }
 0x461   : > { %v1739_v42 = vpop.eup %1738  ;;  %v1383_v43 = vadd.f32 %v2078_v54, %v1382_v41 }
 0x462   : > { %v1418_v44 = vpack.c.bf16 %v1739_v42, %v1739_v42 }
 0x463   : > { %1740 = vtanh.f32 %v1383_v43 }
 0x464   : > { %1435 = vst.msk [vmem:[%s2087_s17 + $0x30] sm:$0xf] %vm1422_vm4, %v1418_v44 }
 0x468   : > { %v1385_v45 = vpop.f32.mrf.mxu0 }
 0x469   : > { %v1741_v46 = vpop.eup %1740  ;;  %v1386_v47 = vadd.f32 %v2078_v54, %v1385_v45 }
 0x46a   : > { %v1419_v48 = vpack.c.bf16 %v1741_v46, %v1741_v46 }
 0x46b   : > { %1742 = vtanh.f32 %v1386_v47 }
 0x46c   : > { %1436 = vst.msk [vmem:[%s2087_s17 + $0x34] sm:$0xf] %vm1422_vm4, %v1419_v48 }
 0x470   : > { %v1387_v49 = vpop.f32.mrf.mxu0 }
 0x471   : > { %v1743_v50 = vpop.eup %1742  ;;  %v1388_v51 = vadd.f32 %v2078_v54, %v1387_v49 }
 0x472   : > { %v1420_v52 = vpack.c.bf16 %v1743_v50, %v1743_v50 }
 0x473   : > { %1744 = vtanh.f32 %v1388_v51 }
 0x474   : > { %1437 = vst.msk [vmem:[%s2087_s17 + $0x38] sm:$0xf] %vm1422_vm4, %v1420_v52 }
 0x479   : > { %v1745_v53 = vpop.eup %1744 }
 0x47a   : > { %v1421_v55 = vpack.c.bf16 %v1745_v53, %v1745_v53 }
 0x47c   : > { %1438 = vst.msk [vmem:[%s2087_s17 + $0x3c] sm:$0xf] %vm1422_vm4, %v1421_v55 }
 0x47d PF: > { %s25_s18 = sadd.s32 1, %s1752_s18  }
 0x47e   : > { %p22_p4 = scmp.ge.s32.totalorder %s25_s18, 6  }
 0x480   :  { %24 = sbr.rel (!%p22_p4) target bundleno = 1 (0x1), region = 110 }

</bundles_post_ra>
